<compile_context>
chip_gen: v5e
topology: v5e:2x2
jax: 0.10.0
libtpu: 0.0.40
codegen_flags: <defaults>
</compile_context>

<pallas_src>
import functools
import math

import jax
import jax.numpy as jnp
from jax import lax
from jax.experimental import pallas as pl
from jax.experimental.pallas import tpu as pltpu


def _round_up(x, m):
    return ((x + m - 1) // m) * m


def _nll_kernel(x_ref, y_ref, out_ref, acc_ref, *, neg_inv_scale):
    # x_ref: (T, L) native dtype; y_ref: (T, G) int32 absolute lane targets
    # (-1 marks padded/invalid rows); out_ref: (1,1,1) f32; acc_ref: (1,L) f32.
    i = pl.program_id(1)

    @pl.when(i == 0)
    def _():
        acc_ref[...] = jnp.zeros_like(acc_ref)

    x = x_ref[...]                          # keep native dtype (no full-tile upcast)
    y = y_ref[...]                          # (T, G) int32
    t, l = x.shape
    g = y.shape[1]

    lane_iota = lax.broadcasted_iota(jnp.int32, (t, l), 1)
    mask = lane_iota == y[:, 0:1]
    for j in range(1, g):                   # unrolled; g <= 128 // C (small)
        mask = jnp.logical_or(mask, lane_iota == y[:, j:j + 1])
    picked = jnp.where(mask, x, jnp.zeros((), x.dtype))

    # Per-lane f32 partial sums: loop-carried dependency is one (1, L) row,
    # not a scalar; the full cross-lane reduce happens once in the epilogue.
    acc_ref[...] += jnp.sum(picked, axis=0, keepdims=True, dtype=jnp.float32)

    @pl.when(i == pl.num_programs(1) - 1)
    def _():
        total = jnp.sum(acc_ref[...]) * neg_inv_scale
        out_ref[...] = jnp.reshape(total, (1, 1, 1))


def _choose_tile_rows(num_rows, row_vmem_bytes, groups_per_row):
    """Bytes-based tile sizing: big enough to amortize per-step overhead,
    small enough that (a) two in-flight tiles fit scoped VMEM on every
    generation and (b) the unrolled per-vreg mask work stays modest."""
    budget = max(512 * 1024,
                 min(8 * 1024 * 1024,
                     (64 * 1024 * 1024) // (2 * groups_per_row + 6)))
    tile = max(8, budget // max(int(row_vmem_bytes), 1))
    # Let both TensorCore halves get work when there is more than one block.
    tile = min(tile, _round_up(pl.cdiv(num_rows, 2), 8))
    return max(8, (tile // 8) * 8)


def negative_log_likelihood(x, y, num_group, *, tile_rows=None):
    """x: (N, num_group, C) log-probabilities, y: (N,) int labels -> scalar f32."""
    N, K, C = x.shape
    assert K == num_group
    total_rows = N * K

    # Lane-dense packing (free row-major reshape; g must divide N*K so that
    # NO copy/pad of x is ever needed).
    g = 1
    if C < 128:
        g = max(1, math.gcd(total_rows, max(1, 128 // C)))
    L = g * C
    R = total_rows // g

    x2 = x.reshape(R, L)                                   # contiguous -> free

    # Absolute lane target per original row: y[n] + slot*C, slot = row % g.
    rows = jnp.arange(total_rows, dtype=jnp.int32)
    y_tgt = y.astype(jnp.int32)[rows // K] + (rows % g) * C
    y2 = y_tgt.reshape(R, g)

    itemsize = jnp.dtype(x.dtype).itemsize
    row_vmem_bytes = _round_up(L, 128) * itemsize          # lane-padded VMEM cost
    if tile_rows is None:
        tile_rows = _choose_tile_rows(R, row_vmem_bytes, g)
    tile_rows = int(tile_rows)
    assert tile_rows % 8 == 0

    total_blocks = pl.cdiv(R, tile_rows)
    tiles_per_core = pl.cdiv(total_blocks, 2)              # 2-way TC split (v7x)
    last_block = total_blocks - 1

    # Pad ONLY the tiny label array to full grid coverage; padded rows get
    # target -1 -> never match -> contribute exactly 0 (x is never padded).
    cover_rows = 2 * tiles_per_core * tile_rows
    if cover_rows != R:
        y2 = jnp.pad(y2, ((0, cover_rows - R), (0, 0)), constant_values=-1)

    kernel = functools.partial(_nll_kernel, neg_inv_scale=-1.0 / (N * K))

    def x_index(c, i):
        # Clamp: the (at most one) grid step past the end of x re-reads the
        # last valid block; its labels are -1 so it contributes nothing.
        return (jnp.minimum(c * tiles_per_core + i, last_block), 0)

    def y_index(c, i):
        return (c * tiles_per_core + i, 0)

    partial_sums = pl.pallas_call(
        kernel,
        out_shape=jax.ShapeDtypeStruct((2, 1, 1), jnp.float32),
        grid=(2, tiles_per_core),
        in_specs=[
            pl.BlockSpec((tile_rows, L), x_index),
            pl.BlockSpec((tile_rows, g), y_index),
        ],
        out_specs=pl.BlockSpec((1, 1, 1), lambda c, i: (c, 0, 0)),
        scratch_shapes=[pltpu.VMEM((1, L), jnp.float32)],
        compiler_params=pltpu.CompilerParams(
            dimension_semantics=("parallel", "arbitrary"),
            vmem_limit_bytes=48 * 1024 * 1024,
        ),
    )(x2, y2)
    return jnp.sum(partial_sums)


if __name__ == "__main__":
    def reference(x, y, k):
        n = x.shape[0]
        ref = 0.0
        for i in range(k):
            ref += jnp.mean(-x[jnp.arange(n), i, y])
        return ref / k

    keys = jax.random.split(jax.random.PRNGKey(0), 6)

    # Case 1: N*K divisible by the lane fold (g=4, L=128), one block per core.
    N, K, C = 8, 4, 32
    x = jax.nn.log_softmax(jax.random.normal(keys[0], (N, K, C), jnp.float32), axis=-1)
    y = jax.random.randint(keys[1], (N,), 0, C, dtype=jnp.int32)
    loss = jax.block_until_ready(negative_log_likelihood(x, y, K))
    ref = reference(x, y, K)
    assert jnp.allclose(loss, ref, atol=1e-5, rtol=1e-5), (loss, ref)

    # Case 2: ragged row count (N*K=27 -> no fold), forced small tile ->
    # multi-step reduction per core, ragged last x block, -1 label padding.
    N, K, C = 9, 3, 32
    x = jax.nn.log_softmax(jax.random.normal(keys[2], (N, K, C), jnp.float32), axis=-1)
    y = jax.random.randint(keys[3], (N,), 0, C, dtype=jnp.int32)
    loss = jax.block_until_ready(negative_log_likelihood(x, y, K, tile_rows=8))
    ref = reference(x, y, K)
    assert jnp.allclose(loss, ref, atol=1e-5, rtol=1e-5), (loss, ref)

    # Case 3: odd number of row blocks (g=2, L=64) -> exercises the clamped
    # extra grid step on the second core-half.
    N, K, C = 75, 2, 32
    x = jax.nn.log_softmax(jax.random.normal(keys[4], (N, K, C), jnp.float32), axis=-1)
    y = jax.random.randint(keys[5], (N,), 0, C, dtype=jnp.int32)
    loss = jax.block_until_ready(negative_log_likelihood(x, y, K, tile_rows=32))
    ref = reference(x, y, K)
    assert jnp.allclose(loss, ref, atol=1e-5, rtol=1e-5), (loss, ref)

    print("KERNEL_OK")
</pallas_src>

<mosaic_0001>
module attributes {stable_mosaic.version = 11 : i64} {
  func.func @_nll_kernel(%arg0: i32, %arg1: i32, %arg2: memref<8x128xf32, #tpu.memory_space<vmem>>, %arg3: memref<8x4xi32, #tpu.memory_space<vmem>>, %arg4: memref<1x1x1xf32, #tpu.memory_space<vmem>>, %arg5: memref<1x128xf32, #tpu.memory_space<vmem>>) attributes {dimension_semantics = [#tpu.dimension_semantics<parallel>, #tpu.dimension_semantics<arbitrary>], iteration_bounds = array<i64: 2, 1>, scalar_prefetch = 0 : i64, scratch_operands = 1 : i64, tpu.core_type = #tpu.core_type<tc>, window_params = [{transform_indices = @transform_0, window_bounds = array<i64: 8, 128>}, {transform_indices = @transform_1, window_bounds = array<i64: 8, 4>}, {transform_indices = @transform_2, window_bounds = array<i64: 1, 1, 1>}]} {
    %c0_i32 = arith.constant 0 : i32
    %0 = arith.cmpi eq, %arg1, %c0_i32 : i32
    %1 = arith.extui %0 : i1 to i32
    %c0_i32_0 = arith.constant 0 : i32
    %2 = arith.cmpi ne, %1, %c0_i32_0 : i32
    scf.if %2 {
      %cst_11 = arith.constant 0.000000e+00 : f32
      %31 = vector.broadcast %cst_11 : f32 to vector<1x128xf32>
      %c0_12 = arith.constant 0 : index
      %c0_13 = arith.constant 0 : index
      %32 = vector.load %arg5[%c0_12, %c0_13] : memref<1x128xf32, #tpu.memory_space<vmem>>, vector<1x128xf32>
      tpu.vector_store %arg5[%c0_12, %c0_13], %31 {strides = array<i32>} : memref<1x128xf32, #tpu.memory_space<vmem>>, vector<1x128xf32>,
    } else {
    }
    %c0 = arith.constant 0 : index
    %c0_1 = arith.constant 0 : index
    %3 = vector.load %arg2[%c0, %c0_1] : memref<8x128xf32, #tpu.memory_space<vmem>>, vector<8x128xf32>
    %c0_2 = arith.constant 0 : index
    %c0_3 = arith.constant 0 : index
    %4 = vector.load %arg3[%c0_2, %c0_3] : memref<8x4xi32, #tpu.memory_space<vmem>>, vector<8x4xi32>
    %5 = tpu.iota {dimensions = array<i32: 1>} : vector<8x128xi32>
    %6 = vector.extract_strided_slice %4 {offsets = [0, 0], sizes = [8, 1], strides = [1, 1]} : vector<8x4xi32> to vector<8x1xi32>
    %7 = vector.broadcast %6 : vector<8x1xi32> to vector<8x128xi32>
    %8 = arith.cmpi eq, %5, %7 : vector<8x128xi32>
    %9 = vector.extract_strided_slice %4 {offsets = [0, 1], sizes = [8, 1], strides = [1, 1]} : vector<8x4xi32> to vector<8x1xi32>
    %10 = vector.broadcast %9 : vector<8x1xi32> to vector<8x128xi32>
    %11 = arith.cmpi eq, %5, %10 : vector<8x128xi32>
    %12 = arith.ori %8, %11 : vector<8x128xi1>
    %13 = vector.extract_strided_slice %4 {offsets = [0, 2], sizes = [8, 1], strides = [1, 1]} : vector<8x4xi32> to vector<8x1xi32>
    %14 = vector.broadcast %13 : vector<8x1xi32> to vector<8x128xi32>
    %15 = arith.cmpi eq, %5, %14 : vector<8x128xi32>
    %16 = arith.ori %12, %15 : vector<8x128xi1>
    %17 = vector.extract_strided_slice %4 {offsets = [0, 3], sizes = [8, 1], strides = [1, 1]} : vector<8x4xi32> to vector<8x1xi32>
    %18 = vector.broadcast %17 : vector<8x1xi32> to vector<8x128xi32>
    %19 = arith.cmpi eq, %5, %18 : vector<8x128xi32>
    %20 = arith.ori %16, %19 : vector<8x128xi1>
    %cst = arith.constant 0.000000e+00 : f32
    %21 = vector.broadcast %cst : f32 to vector<8x128xf32>
    %22 = arith.select %20, %3, %21 : vector<8x128xi1>, vector<8x128xf32>
    %c0_4 = arith.constant 0 : index
    %c0_5 = arith.constant 0 : index
    %23 = vector.load %arg5[%c0_4, %c0_5] : memref<1x128xf32, #tpu.memory_space<vmem>>, vector<1x128xf32>
    %cst_6 = arith.constant dense<0.000000e+00> : vector<128xf32>
    %24 = vector.multi_reduction <add>, %22, %cst_6 [0] : vector<8x128xf32> to vector<128xf32>
    %25 = vector.shape_cast %24 : vector<128xf32> to vector<1x128xf32>
    %26 = arith.addf %23, %25 : vector<1x128xf32>
    %c0_7 = arith.constant 0 : index
    %c0_8 = arith.constant 0 : index
    %27 = vector.load %arg5[%c0_7, %c0_8] : memref<1x128xf32, #tpu.memory_space<vmem>>, vector<1x128xf32>
    tpu.vector_store %arg5[%c0_7, %c0_8], %26 {strides = array<i32>} : memref<1x128xf32, #tpu.memory_space<vmem>>, vector<1x128xf32>,
    %c0_i32_9 = arith.constant 0 : i32
    %28 = arith.cmpi eq, %arg1, %c0_i32_9 : i32
    %29 = arith.extui %28 : i1 to i32
    %c0_i32_10 = arith.constant 0 : i32
    %30 = arith.cmpi ne, %29, %c0_i32_10 : i32
    scf.if %30 {
      %c0_11 = arith.constant 0 : index
      %c0_12 = arith.constant 0 : index
      %31 = vector.load %arg5[%c0_11, %c0_12] : memref<1x128xf32, #tpu.memory_space<vmem>>, vector<1x128xf32>
      %32 = vector.shape_cast %31 : vector<1x128xf32> to vector<1x1x128xf32>
      %cst_13 = arith.constant dense<0.000000e+00> : vector<1xf32>
      %33 = vector.multi_reduction <add>, %32, %cst_13 [1, 2] : vector<1x1x128xf32> to vector<1xf32>
      %34 = vector.shape_cast %33 : vector<1xf32> to vector<1x1x1xf32>
      %35 = vector.extract %34[0, 0, 0] : f32 from vector<1x1x1xf32>
      %cst_14 = arith.constant -3.125000e-02 : f32
      %36 = arith.mulf %35, %cst_14 : f32
      %37 = vector.broadcast %36 : f32 to vector<1x1x1xf32>
      %c0_15 = arith.constant 0 : index
      %c0_16 = arith.constant 0 : index
      %c0_17 = arith.constant 0 : index
      %38 = vector.load %arg4[%c0_15, %c0_16, %c0_17] : memref<1x1x1xf32, #tpu.memory_space<vmem>>, vector<1x1x1xf32>
      tpu.vector_store %arg4[%c0_15, %c0_16, %c0_17], %37 {strides = array<i32>} : memref<1x1x1xf32, #tpu.memory_space<vmem>>, vector<1x1x1xf32>,
    } else {
    }
    return
  }
  func.func @transform_0(%arg0: i32, %arg1: i32) -> (i32, i32) {
    %c1_i32 = arith.constant 1 : i32
    %0 = arith.muli %arg0, %c1_i32 : i32
    %1 = arith.addi %0, %arg1 : i32
    %c0_i32 = arith.constant 0 : i32
    %2 = arith.minsi %1, %c0_i32 : i32
    %c0_i32_0 = arith.constant 0 : i32
    %c0_i32_1 = arith.constant 0 : i32
    return %2, %c0_i32_0 : i32, i32
  }
  func.func @transform_1(%arg0: i32, %arg1: i32) -> (i32, i32) {
    %c1_i32 = arith.constant 1 : i32
    %0 = arith.muli %arg0, %c1_i32 : i32
    %1 = arith.addi %0, %arg1 : i32
    %c0_i32 = arith.constant 0 : i32
    %c0_i32_0 = arith.constant 0 : i32
    return %1, %c0_i32 : i32, i32
  }
  func.func @transform_2(%arg0: i32, %arg1: i32) -> (i32, i32, i32) {
    %c0_i32 = arith.constant 0 : i32
    %c0_i32_0 = arith.constant 0 : i32
    %c0_i32_1 = arith.constant 0 : i32
    return %arg0, %c0_i32, %c0_i32_0 : i32, i32, i32
  }
}

</mosaic_0001>

<bundles_post_ra>
// kernel: tpu_custom_call.1
= control target key start
LH: loop header
LB: loop body
LE: loop exit
PB: predicated region body
PF: predicated region fallthrough
CT: control target
= control target key end

     0   :  { %s410_s9 = smov 0   ;;  %s412_s10 = smov 0   ;;  %s456_s0 = inlined_call_operand.vmem [shape: f32[8,128], index: 0, kind: input, shape index: {}]   ;;  %s457_s1 = inlined_call_operand.vmem [shape: s32[16,4], index: 1, kind: input, shape index: {}]   ;;  %s458_s2 = inlined_call_operand.vmem [shape: f32[2,1,1], index: 2, kind: output, shape index: {}]  }
   0x1   :  { %s414_s11 = smov 0  }
   0x2 LB: > { %s24_s12 = sadd.s32 1, %s384_s10  ;;  %p322_p0 = scmp.ge.s32.totalorder %s388_s11, 1  ;;  %s388_s11 = sphi %s414_s11, %s12_s11   ;;  %s384_s10 = sphi %s412_s10, %s460_s10   ;;  %s380_s9 = sphi %s410_s9, %s459_s9  }
   0x3   : > { %p26_p1 = scmp.ge.s32.totalorder %s24_s12, 2  ;;  %p148_p2 = scmp.lt.s32.totalorder %s388_s11, 3 }
   0x5   : > { %s462_s12 = smov (%p26_p1, %s24_s12), 0  ;;  %p149_p3 = pnand %p322_p0, %p148_p2 }
   0x6   : > { %p186_p4 = scmp.lt.s32.totalorder (!%p149_p3), %s380_s9, 1  ;;  %p176_p5 = scmp.lt.s32.totalorder (!%p149_p3), %s380_s9, 0 }
   0x7   : > { %152 = sbr.rel (%p149_p3) target bundleno = 351 (0x15f), region = 28 }
   0xc   : > { %v390_v0 = vmov 0   ;;  %v391_v1 = vmov 2   ;;  %s432_s13 = scalar_select %p186_p4, %s380_s9, 1  ;;  %v392_v3 = vmov 1   ;;  %v393_v4 = vmov 3  }
   0xd   : > { %361 = vset.pattern.permute.xlu0 %v390_v0  ;;  %363 = vset.pattern.permute.xlu1 %v391_v1  ;;  %v394_v5 = vmov 0.0   ;;  %s464_s9 = smov (!%p176_p5, %s380_s9), 0  ;;  %v201_v8 = vlaneseq  ;;  %vm236_vm7 = vcmask 1040384   ;;  %vm249_vm8 = vcmask 0  }
   0xe   : > { %s327_s14 = sshll.u32 %s432_s13, 3  ;;  %198 = vst [vmem:[#allocation2] sm:$0x1] %v394_v5  ;;  %s466_s9 = smov (!%p176_p5, %s464_s9), 0 }
   0xf   : > { %s189_s17 = scalar_lea.vmem %s457_s1, %s327_s14  ;;  %s326_s18 = sshll.u32 %s466_s9, 3  ;;  %v202_v9 = vand.u32 127, %v201_v8 }
  0x10   : > { %v200_v2 = vld [vmem:[%s189_s17] sm:$0xff]  ;;  %s181_s21 = scalar_lea.vmem %s456_s0, %s326_s18  ;;  %s193_s25 = scalar_lea.vmem %s458_s2, %s432_s13 }
  0x11   : > { %204 = vperm.xlu0 %361, %v200_v2   ;;  %213 = vperm.xlu1 %363, %v200_v2   ;;  %v199_v12 = vld [vmem:[%s181_s21] sm:$0xff] }
  0x15   : > { %v223_v19 = vld [vmem:[#allocation2] sm:$0x1] }
  0x19   : > { %362 = vset.pattern.permute.xlu0 %v392_v3  ;;  %364 = vset.pattern.permute.xlu1 %v393_v4 }
  0x1a   : > { %208 = vperm.xlu0 %362, %v200_v2   ;;  %218 = vperm.xlu1 %364, %v200_v2  }
  0x22   : > { %365 = vset.pattern.permute.xlu0 %v393_v4 }
  0x83   : > { %v205_v6 = vpop.permute.xlu0 %204  ;;  %v214_v7 = vpop.permute.xlu1 %213 }
  0x84   : > { %vm206_vm0 = vcmp.eq.s32.totalorder %v202_v9, %v205_v6  ;;  %vm215_vm3 = vcmp.eq.s32.totalorder %v202_v9, %v214_v7 }
  0x8c   : > { %v209_v10 = vpop.permute.xlu0 %208  ;;  %v219_v11 = vpop.permute.xlu1 %218 }
  0x8d   : > { %vm210_vm1 = vcmp.eq.s32.totalorder %v202_v9, %v209_v10  ;;  %vm220_vm2 = vcmp.eq.s32.totalorder %v202_v9, %v219_v11 }
  0x8e   : > { %vm211_vm4 = vmor %vm206_vm0, %vm210_vm1 }
  0x8f   : > { %vm216_vm5 = vmor %vm211_vm4, %vm215_vm3 }
  0x90   : > { %vm221_vm6 = vmor %vm216_vm5, %vm220_vm2 }
  0x91   : > { %v222_v13 = vsel %vm221_vm6, %v199_v12, 0.0 }
  0x92   : > { %v224_v14 = vrot.slane %v222_v13, 4 }
  0x94   : > { %v225_v15 = vadd.f32 %v224_v14, %v222_v13 }
  0x96   : > { %v226_v16 = vrot.slane %v225_v15, 2 }
  0x98   : > { %v227_v17 = vadd.f32 %v226_v16, %v225_v15 }
  0x9a   : > { %v228_v18 = vrot.slane %v227_v17, 1 }
  0x9c   : > { %v229_v20 = vadd.f32 %v228_v18, %v227_v17 }
  0x9e   : > { %v230_v21 = vadd.f32 %v229_v20, %v223_v19 }
  0xa0   : > { %231 = vst [vmem:[#allocation2] sm:$0x1] %v230_v21 }
  0xa7   : > { %v235_v22 = vld [vmem:[#allocation2] sm:$0x1] }
  0xa8   : > { %v237_v23 = vsel %vm236_vm7, %v235_v22, 0.0 }
  0xa9   : > { %238 = vadd.xlane.f32.xlu2 %v237_v23 }
 0x11c   : > { %v239_v24 = vpop.xlane.xlu2 %238 }
 0x11d   : > { %v240_v25 = vrot.slane %v239_v24, 4 }
 0x11f   : > { %v241_v26 = vadd.f32 %v240_v25, %v239_v24 }
 0x121   : > { %v242_v27 = vrot.slane %v241_v26, 2 }
 0x123   : > { %v243_v28 = vadd.f32 %v242_v27, %v241_v26 }
 0x125   : > { %v244_v29 = vrot.slane %v243_v28, 1 }
 0x127   : > { %v245_v30 = vadd.f32 %v244_v29, %v243_v28 }
 0x129   : > { %330 = vpush %v245_v30 }
 0x15a   : > { %s331_s22 = spop %330 }
 0x15b   : > { %s247_s26 = smul.f32 -0.03125, %s331_s22 }
 0x15d   : > { %v248_v31 = vstv %s247_s26 }
 0x15e   : > { %250 = vst.msk [vmem:[%s193_s25] sm:$0x1] %vm249_vm8, %v248_v31 }
 0x15f PF: > { %s12_s11 = sadd.s32 1, %s388_s11   ;;  %s459_s9 = smov %s384_s10 }
 0x160   : > { %p9_p6 = scmp.ge.s32.totalorder %s12_s11, 4   ;;  %s460_s10 = smov %s462_s12 }
 0x162   :  { %11 = sbr.rel (!%p9_p6) target bundleno = 2 (0x2), region = 69 }

</bundles_post_ra>
